<compile_context>
chip_gen: v5e
topology: v5e:2x2
jax: 0.10.0
libtpu: 0.0.40
codegen_flags: <defaults>
</compile_context>

<pallas_src>
import jax
import jax.numpy as jnp
from jax.experimental import pallas as pl
from jax.experimental.pallas import tpu as pltpu

LANES = 128                      # vreg lane width: trailing dim stays lane-dense
SUBLANES = 8                     # vreg sublane count
_MAX_SINGLE_BLOCK_ROWS = 1024    # <= 512 KiB/buffer -> single full-VMEM block
_TILE_ROWS = 1024                # gridded path tile: (1024, 128) f32 = 512 KiB


def _example_model_kernel(bias_ref, x_ref, o_ref):
    # (x + 1) + bias == x + (1 + bias): the scalar fold costs one scalar-ALU
    # add (idle slot); the VPU does exactly one vadd per vreg and the store is
    # an unmasked vst because the tile is lane-dense (last dim = 128).
    # (Re-association differs from torch by <= 1 ULP; exact for bias == 0.)
    o_ref[...] = x_ref[...] + (bias_ref[0, 0] + 1.0)


def _forward_impl(x, bias):
    """Elementwise (x + 1) + bias for any-shaped float x and scalar bias."""
    orig_shape = x.shape
    orig_dtype = x.dtype
    total = x.size

    # Choose layout quantum so blocks always divide the padded slab exactly:
    #   small inputs -> one full-array VMEM block (rows multiple of 8)
    #   large inputs -> streamed (1024, 128) tiles (rows multiple of 1024)
    if total <= _MAX_SINGLE_BLOCK_ROWS * LANES:
        quantum = SUBLANES * LANES
        single_block = True
    else:
        quantum = _TILE_ROWS * LANES
        single_block = False

    padded_total = pl.cdiv(total, quantum) * quantum
    flat = x.reshape(-1)
    if padded_total != total:
        flat = jnp.pad(flat, (0, padded_total - total))
    x2 = flat.reshape(-1, LANES)            # lane-dense slab (rows, 128)
    rows = x2.shape[0]

    tile_rows = rows if single_block else _TILE_ROWS
    grid = (rows // tile_rows,)

    bias_smem = jnp.asarray(bias, orig_dtype).reshape(1, 1)

    out2 = pl.pallas_call(
        _example_model_kernel,
        out_shape=jax.ShapeDtypeStruct(x2.shape, orig_dtype),
        grid=grid,
        in_specs=[
            pl.BlockSpec(memory_space=pltpu.SMEM),               # (1,1) bias
            pl.BlockSpec((tile_rows, LANES), lambda i: (i, 0)),   # x row tile
        ],
        out_specs=pl.BlockSpec((tile_rows, LANES), lambda i: (i, 0)),
        # Elementwise, shape/dtype preserving: write in place (effective when
        # x is donated at the jit boundary; otherwise XLA copies defensively).
        input_output_aliases={1: 0},
        compiler_params=pltpu.CompilerParams(
            dimension_semantics=("parallel",),  # v7x: both TCs split the rows
        ),
    )(bias_smem, x2)

    out_flat = out2.reshape(-1)
    if padded_total != total:
        out_flat = out_flat[:total]
    return out_flat.reshape(orig_shape)


# Single executable; donating x lets the pallas alias write in place.
example_model_forward = jax.jit(_forward_impl, donate_argnums=(0,))


if __name__ == "__main__":
    key = jax.random.PRNGKey(0)
    x = jax.random.normal(key, (2, 4, 16, 16), dtype=jnp.float32)

    # Parameter from __init__: torch.zeros(()) -> scalar bias = 0.0
    bias = jnp.zeros((), dtype=jnp.float32)

    # x is donated to the jitted call -> compute the reference BEFORE calling.
    ref = (x + 1.0) + bias

    out = example_model_forward(x, bias)
    out = jax.block_until_ready(out)

    assert out.shape == ref.shape and out.dtype == ref.dtype
    assert jnp.allclose(out, ref, atol=1e-6), "mismatch vs reference"

    # Also exercise the gridded/padded streaming path once (non-128-multiple
    # element count, > 1024 rows) to validate the tiled code path.
    xb = jax.random.normal(jax.random.PRNGKey(1), (3, 7, 131, 67),
                           dtype=jnp.float32)
    refb = (xb + 1.0) + bias
    outb = jax.block_until_ready(example_model_forward(xb, bias))
    assert outb.shape == refb.shape and outb.dtype == refb.dtype
    assert jnp.allclose(outb, refb, atol=1e-6), "mismatch vs reference (gridded)"

    print("KERNEL_OK")
</pallas_src>

<mosaic_0001>
module attributes {stable_mosaic.version = 11 : i64} {
  func.func @_example_model_kernel(%arg0: i32, %arg1: memref<1x1xf32, #tpu.memory_space<smem>>, %arg2: memref<16x128xf32, #tpu.memory_space<vmem>>, %arg3: memref<16x128xf32, #tpu.memory_space<vmem>>) attributes {dimension_semantics = [#tpu.dimension_semantics<parallel>], iteration_bounds = array<i64: 1>, scalar_prefetch = 0 : i64, scratch_operands = 0 : i64, tpu.core_type = #tpu.core_type<tc>, window_params = [{transform_indices = @transform_0, window_bounds = array<i64: 1, 1>}, {transform_indices = @transform_1, window_bounds = array<i64: 16, 128>}, {transform_indices = @transform_2, window_bounds = array<i64: 16, 128>}]} {
    %c0 = arith.constant 0 : index
    %c0_0 = arith.constant 0 : index
    %0 = vector.load %arg2[%c0, %c0_0] : memref<16x128xf32, #tpu.memory_space<vmem>>, vector<16x128xf32>
    %c0_1 = arith.constant 0 : index
    %c0_2 = arith.constant 0 : index
    %1 = memref.load %arg1[%c0_1, %c0_2] : memref<1x1xf32, #tpu.memory_space<smem>>
    %cst = arith.constant 1.000000e+00 : f32
    %2 = arith.addf %1, %cst : f32
    %3 = vector.broadcast %2 : f32 to vector<16x128xf32>
    %4 = arith.addf %0, %3 : vector<16x128xf32>
    %c0_3 = arith.constant 0 : index
    %c0_4 = arith.constant 0 : index
    %5 = vector.load %arg3[%c0_3, %c0_4] : memref<16x128xf32, #tpu.memory_space<vmem>>, vector<16x128xf32>
    tpu.vector_store %arg3[%c0_3, %c0_4], %4 {strides = array<i32>} : memref<16x128xf32, #tpu.memory_space<vmem>>, vector<16x128xf32>,
    return
  }
  func.func @transform_0(%arg0: i32) -> (i32, i32) {
    %c0_i32 = arith.constant 0 : i32
    %c0_i32_0 = arith.constant 0 : i32
    %c0_i32_1 = arith.constant 0 : i32
    return %c0_i32, %c0_i32_0 : i32, i32
  }
  func.func @transform_1(%arg0: i32) -> (i32, i32) {
    %c0_i32 = arith.constant 0 : i32
    %c0_i32_0 = arith.constant 0 : i32
    return %arg0, %c0_i32 : i32, i32
  }
  func.func @transform_2(%arg0: i32) -> (i32, i32) {
    %c0_i32 = arith.constant 0 : i32
    %c0_i32_0 = arith.constant 0 : i32
    return %arg0, %c0_i32 : i32, i32
  }
}

</mosaic_0001>

<bundles_post_ra>
// kernel: _forward_impl.1
= control target key start
LH: loop header
LB: loop body
LE: loop exit
PB: predicated region body
PF: predicated region fallthrough
CT: control target
= control target key end

     0   :  { %s55_s0 = inlined_call_operand.<no memory space> [shape: f32[1,1], index: 0, kind: input, shape index: {}]   ;;  %s56_s1 = inlined_call_operand.vmem [shape: f32[16,128], index: 1, kind: input, shape index: {}, may-alias: {1,2}]   ;;  %s57_s2 = inlined_call_operand.vmem [shape: f32[16,128], index: 2, kind: output, shape index: {}, may-alias: {1,2}]  }
   0x1   :  { %v12_v0 = vld [vmem:[%s56_s1] sm:$0xff]  ;;  %s15_s13 = sadd.f32 1.0, %s55_s0  ;;  %v13_v1 = vld [vmem:[%s56_s1 + $0x8] sm:$0xff] }
   0x3   :  { %v16_v2 = vstv %s15_s13 }
   0x4   :  { %v17_v3 = vadd.f32 %v16_v2, %v12_v0  ;;  %v18_v4 = vadd.f32 %v16_v2, %v13_v1 }
   0x6   :  { %19 = vst [vmem:[%s57_s2] sm:$0xff] %v17_v3 }
   0x7   :  { %20 = vst [vmem:[%s57_s2 + $0x8] sm:$0xff] %v18_v4 }

</bundles_post_ra>
